<compile_context>
chip_gen: v7x
topology: tpu7x:2x2x1
jax: 0.10.0
libtpu: 0.0.40
codegen_flags: <defaults>
</compile_context>

<pallas_src>
import jax
import jax.numpy as jnp
from jax.experimental import pallas as pl
from jax.experimental.pallas import tpu as pltpu


def _round_up(x, m):
    return ((x + m - 1) // m) * m


def _vmem_limit_bytes():
    # 128 MiB physical on v5e/v6e, 64 MiB on v7x; keep 25% headroom, cap at 100 MiB.
    try:
        phys = int(pltpu.get_tpu_info().vmem_capacity_bytes)
        return min(100 * 1024 * 1024, (phys * 3) // 4)
    except Exception:
        return 48 * 1024 * 1024


_VMEM_LIMIT = _vmem_limit_bytes()


# ----------------------------------------------------------------------------
# Phase (space-to-depth) split: spatially pad, then split into stride*stride
# phase images so every conv / pool tap is a contiguous unit-stride slice
# inside the kernel.  Total bytes ~= input bytes (NOT 9x like im2col).
# Returns (N*s*s, Hph, Wph, C) plus the per-image phase-block shape.
# ----------------------------------------------------------------------------
def _phase_split(x_nhwc, stride, pad, pad_value=0.0):
    N, H, W, C = x_nhwc.shape
    xp = x_nhwc
    if pad > 0:
        xp = jnp.pad(xp, ((0, 0), (pad, pad), (pad, pad), (0, 0)),
                     constant_values=pad_value)
    Hp, Wp = H + 2 * pad, W + 2 * pad
    s = stride
    if s == 1:
        return xp.reshape(N, Hp, Wp, C), (1, Hp, Wp)
    Hp2, Wp2 = _round_up(Hp, s), _round_up(Wp, s)
    if (Hp2, Wp2) != (Hp, Wp):
        # Uniformity padding only; these rows/cols are provably never read by any tap.
        xp = jnp.pad(xp, ((0, 0), (0, Hp2 - Hp), (0, Wp2 - Wp), (0, 0)),
                     constant_values=pad_value)
    Hph, Wph = Hp2 // s, Wp2 // s
    ph = xp.reshape(N, Hph, s, Wph, s, C)
    ph = jnp.transpose(ph, (0, 2, 4, 1, 3, 5))          # (N, sy, sx, Hph, Wph, C)
    return ph.reshape(N * s * s, Hph, Wph, C), (s * s, Hph, Wph)


# ----------------------------------------------------------------------------
# Fused conv:  out = ReLU( LN( patches @ B + bias ) * gamma + beta (+ residual) )
# One grid step per image; weights fully VMEM-resident; bf16 MXU, f32 accumulation.
# ----------------------------------------------------------------------------
def _make_conv_ln_kernel(kh, kw, stride, Ho, Wo, c_true, Np, relu, has_res, eps=1e-5):
    s = stride
    M = Ho * Wo
    inv_c = 1.0 / float(c_true)

    def _body(x_ref, b_ref, bias_ref, g_ref, bb_ref, res_ref, o_ref):
        # Build the (M, kh*kw*Cp) patch matrix from contiguous in-VMEM slices.
        taps = []
        for dy in range(kh):
            for dx in range(kw):
                ph = (dy % s) * s + (dx % s)
                t = x_ref[ph, dy // s:dy // s + Ho, dx // s:dx // s + Wo, :]
                taps.append(t.reshape(M, t.shape[-1]))
        a = taps[0] if len(taps) == 1 else jnp.concatenate(taps, axis=-1)

        acc = jnp.dot(a, b_ref[...], preferred_element_type=jnp.float32)   # (M, Np) f32
        x = acc + bias_ref[...]

        # Channel LayerNorm over the c_true real channels (padded lanes are exactly 0
        # and are masked out of the variance; gamma/beta padding keeps them 0).
        lane = jax.lax.broadcasted_iota(jnp.int32, (1, Np), 1)
        cmask = (lane < c_true).astype(jnp.float32)
        mean = jnp.sum(x, axis=-1, keepdims=True) * inv_c
        xc = (x - mean) * cmask
        var = jnp.sum(xc * xc, axis=-1, keepdims=True) * inv_c
        y = xc * jax.lax.rsqrt(var + eps) * g_ref[...] + bb_ref[...]

        if res_ref is not None:
            y = y + res_ref[...].reshape(M, Np).astype(jnp.float32)
        if relu:
            y = jnp.maximum(y, 0.0)
        o_ref[...] = y.reshape(1, Ho, Wo, Np).astype(o_ref.dtype)

    if has_res:
        def kernel(x_ref, b_ref, bias_ref, g_ref, bb_ref, res_ref, o_ref):
            _body(x_ref, b_ref, bias_ref, g_ref, bb_ref, res_ref, o_ref)
    else:
        def kernel(x_ref, b_ref, bias_ref, g_ref, bb_ref, o_ref):
            _body(x_ref, b_ref, bias_ref, g_ref, bb_ref, None, o_ref)
    return kernel


def conv_ln(x_nhwc, wp, kh, kw, stride, pad, c_true, relu, residual=None):
    """x_nhwc: (N, H, W, Cp) bf16, padded channels == 0.  Returns (N, Ho, Wo, Np) bf16."""
    N, H, W, Cp = x_nhwc.shape
    Ho = (H + 2 * pad - kh) // stride + 1
    Wo = (W + 2 * pad - kw) // stride + 1
    K, Np = wp['w'].shape
    assert K == kh * kw * Cp, (K, kh, kw, Cp)

    phases, (ss, Hph, Wph) = _phase_split(x_nhwc, stride, pad)

    args = [phases, wp['w'], wp['bias'], wp['gamma'], wp['beta']]
    in_specs = [
        pl.BlockSpec((ss, Hph, Wph, Cp), lambda n: (n, 0, 0, 0)),   # one image's phases
        pl.BlockSpec((K, Np), lambda n: (0, 0)),                    # full weights, resident
        pl.BlockSpec((1, Np), lambda n: (0, 0)),                    # bias
        pl.BlockSpec((1, Np), lambda n: (0, 0)),                    # gamma
        pl.BlockSpec((1, Np), lambda n: (0, 0)),                    # beta
    ]
    has_res = residual is not None
    if has_res:
        args.append(residual)
        in_specs.append(pl.BlockSpec((1, Ho, Wo, Np), lambda n: (n, 0, 0, 0)))

    return pl.pallas_call(
        _make_conv_ln_kernel(kh, kw, stride, Ho, Wo, c_true, Np, relu, has_res),
        out_shape=jax.ShapeDtypeStruct((N, Ho, Wo, Np), jnp.bfloat16),
        grid=(N,),
        in_specs=in_specs,
        out_specs=pl.BlockSpec((1, Ho, Wo, Np), lambda n: (n, 0, 0, 0)),
        compiler_params=pltpu.CompilerParams(
            dimension_semantics=("parallel",),
            vmem_limit_bytes=_VMEM_LIMIT),
    )(*args)


# ----------------------------------------------------------------------------
# MaxPool 3x3 / stride 2 / pad 1 : direct read of the (phase-split) padded input,
# 9-tap max via in-VMEM slices.  No HBM view materialization.
# ----------------------------------------------------------------------------
def _make_maxpool_kernel(Ho, Wo, k, s):
    def kernel(x_ref, o_ref):
        m = None
        for dy in range(k):
            for dx in range(k):
                ph = (dy % s) * s + (dx % s)
                t = x_ref[ph, dy // s:dy // s + Ho, dx // s:dx // s + Wo, :]
                m = t if m is None else jnp.maximum(m, t)
        o_ref[...] = m[None]
    return kernel


def maxpool3x3_s2(x_nhwc):
    N, H, W, C = x_nhwc.shape
    k, s, pad = 3, 2, 1
    Ho = (H + 2 * pad - k) // s + 1
    Wo = (W + 2 * pad - k) // s + 1
    phases, (ss, Hph, Wph) = _phase_split(x_nhwc, s, pad, pad_value=-jnp.inf)
    return pl.pallas_call(
        _make_maxpool_kernel(Ho, Wo, k, s),
        out_shape=jax.ShapeDtypeStruct((N, Ho, Wo, C), x_nhwc.dtype),
        grid=(N,),
        in_specs=[pl.BlockSpec((ss, Hph, Wph, C), lambda n: (n, 0, 0, 0))],
        out_specs=pl.BlockSpec((1, Ho, Wo, C), lambda n: (n, 0, 0, 0)),
        compiler_params=pltpu.CompilerParams(
            dimension_semantics=("parallel",),
            vmem_limit_bytes=_VMEM_LIMIT),
    )(phases)


# ----------------------------------------------------------------------------
# Weight standardization kernel (per-output-channel, unbiased std like torch.std).
# Runs once at parameter-preprocessing time.
# ----------------------------------------------------------------------------
def _make_ws_kernel(k_true):
    def kernel(w_ref, o_ref):
        w = w_ref[...]
        mean = jnp.mean(w, axis=1, keepdims=True)
        wc = w - mean
        var = jnp.sum(wc * wc, axis=1, keepdims=True) / float(k_true - 1)
        o_ref[...] = wc / (jnp.sqrt(var) + 1e-5)
    return kernel


def weight_standardize(w2d):
    cout, k = w2d.shape
    return pl.pallas_call(
        _make_ws_kernel(k),
        out_shape=jax.ShapeDtypeStruct((cout, k), jnp.float32),
        in_specs=[pl.BlockSpec(memory_space=pltpu.MemorySpace.VMEM)],
        out_specs=pl.BlockSpec(memory_space=pltpu.MemorySpace.VMEM),
    )(w2d)


# ----------------------------------------------------------------------------
# Fused global average pool + fc head (single tiny Pallas call, lane-dense output).
# ----------------------------------------------------------------------------
def _make_head_kernel(hw):
    inv = 1.0 / float(hw)

    def kernel(x_ref, w_ref, b_ref, o_ref):
        feat = jnp.sum(x_ref[...].astype(jnp.float32), axis=1) * inv      # (N, C)
        o_ref[...] = jnp.dot(feat.astype(jnp.bfloat16), w_ref[...],
                             preferred_element_type=jnp.float32) + b_ref[...]
    return kernel


def head(x_nhwc, fp, num_classes):
    N, H, W, C = x_nhwc.shape
    x3 = x_nhwc.reshape(N, H * W, C)
    ncp = fp['w'].shape[1]
    out = pl.pallas_call(
        _make_head_kernel(H * W),
        out_shape=jax.ShapeDtypeStruct((N, ncp), jnp.float32),
        in_specs=[pl.BlockSpec(memory_space=pltpu.MemorySpace.VMEM)] * 3,
        out_specs=pl.BlockSpec(memory_space=pltpu.MemorySpace.VMEM),
        compiler_params=pltpu.CompilerParams(vmem_limit_bytes=_VMEM_LIMIT),
    )(x3, fp['w'], fp['b'])
    return out[:, :num_classes]


# ----------------------------------------------------------------------------
# One-time parameter preprocessing (weight-std, transpose, channel pad, bf16 cast).
# ----------------------------------------------------------------------------
LAYER_CFG = [(64, 2, 1), (128, 2, 2), (256, 2, 2), (512, 2, 2)]  # (planes, blocks, stride)


def _prep_conv(w_oihw, bias, gamma, beta, weight_std, cin_pad):
    cout, cin, kh, kw = w_oihw.shape
    w = w_oihw.astype(jnp.float32)
    if weight_std:
        w = weight_standardize(w.reshape(cout, -1)).reshape(cout, cin, kh, kw)
    if cin_pad > cin:
        w = jnp.pad(w, ((0, 0), (0, cin_pad - cin), (0, 0), (0, 0)))
    np_ = _round_up(cout, 128)
    # B[(dy*kw+dx)*cin_pad + c, o] = w[o, c, dy, dx]  (matches in-kernel tap concat order)
    b_mat = jnp.transpose(w, (2, 3, 1, 0)).reshape(kh * kw * cin_pad, cout)
    b_mat = jnp.pad(b_mat, ((0, 0), (0, np_ - cout))).astype(jnp.bfloat16)
    bias_p = jnp.zeros((1, np_), jnp.float32)
    if bias is not None:
        bias_p = bias_p.at[0, :cout].set(bias)
    gamma_p = jnp.zeros((1, np_), jnp.float32).at[0, :cout].set(gamma)
    beta_p = jnp.zeros((1, np_), jnp.float32).at[0, :cout].set(beta)
    return {'w': b_mat, 'bias': bias_p, 'gamma': gamma_p, 'beta': beta_p}


def preprocess_params(params):
    pp = {'stem': _prep_conv(params['stem_w'], None, params['stem_ln_g'],
                             params['stem_ln_b'], weight_std=True, cin_pad=128)}
    layers = []
    inplanes = 64
    for li, (planes, nblocks, _stride) in enumerate(LAYER_CFG):
        blocks = []
        for bi in range(nblocks):
            raw = params['layers'][li][bi]
            inp = inplanes if bi == 0 else planes
            blk = {
                'conv1': _prep_conv(raw['conv1_w'], raw['conv1_b'],
                                    raw['ln1_g'], raw['ln1_b'],
                                    weight_std=True, cin_pad=_round_up(inp, 128)),
                'conv2': _prep_conv(raw['conv2_w'], None,
                                    raw['ln2_g'], raw['ln2_b'],
                                    weight_std=False, cin_pad=_round_up(planes, 128)),
            }
            if 'down_w' in raw:
                blk['down'] = _prep_conv(raw['down_w'], None,
                                         raw['dln_g'], raw['dln_b'],
                                         weight_std=False, cin_pad=_round_up(inp, 128))
            blocks.append(blk)
        layers.append(blocks)
        inplanes = planes
    pp['layers'] = layers

    fc_w, fc_b = params['fc_w'], params['fc_b']
    nc = fc_w.shape[1]
    ncp = _round_up(nc, 128)
    pp['fc'] = {
        'w': jnp.pad(fc_w, ((0, 0), (0, ncp - nc))).astype(jnp.bfloat16),
        'b': jnp.pad(fc_b.reshape(1, nc), ((0, 0), (0, ncp - nc))).astype(jnp.float32),
    }
    return pp


# ----------------------------------------------------------------------------
# Forward pass
# ----------------------------------------------------------------------------
def basic_block(x, bp, stride, planes):
    out = conv_ln(x, bp['conv1'], 3, 3, stride, 1, c_true=planes, relu=True)
    if 'down' in bp:
        identity = conv_ln(x, bp['down'], 1, 1, stride, 0, c_true=planes, relu=False)
    else:
        identity = x
    return conv_ln(out, bp['conv2'], 3, 3, 1, 1, c_true=planes, relu=True,
                   residual=identity)


def resnet_forward(pp, x_nchw, num_classes):
    # NCHW in (PyTorch convention) -> NHWC bf16 internally, channels padded to 128.
    x = jnp.transpose(x_nchw, (0, 2, 3, 1)).astype(jnp.float32)
    C = x.shape[-1]
    Cp = _round_up(C, 128)
    x = jnp.pad(x, ((0, 0), (0, 0), (0, 0), (0, Cp - C))).astype(jnp.bfloat16)

    x = conv_ln(x, pp['stem'], 3, 3, 1, 1, c_true=64, relu=True)     # WS conv + LN + ReLU
    x = maxpool3x3_s2(x)
    for layer_pp, (planes, _nb, stride) in zip(pp['layers'], LAYER_CFG):
        for bi, bp in enumerate(layer_pp):
            x = basic_block(x, bp, stride if bi == 0 else 1, planes)
    return head(x, pp['fc'], num_classes)                            # fused GAP + fc


# ----------------------------------------------------------------------------
# Deterministic parameter initialization (synthetic; shapes from the module)
# ----------------------------------------------------------------------------
def init_params(num_classes, key):
    keys = iter(jax.random.split(key, 256))

    def conv_w(cout, cin, kh, kw):
        std = (2.0 / (cout * kh * kw)) ** 0.5            # kaiming_normal, fan_out, relu
        return std * jax.random.normal(next(keys), (cout, cin, kh, kw), jnp.float32)

    def conv_b(cout, fan_in):
        bound = 1.0 / (fan_in ** 0.5)
        return jax.random.uniform(next(keys), (cout,), jnp.float32, -bound, bound)

    def lin(in_f, out_f):
        bound = 1.0 / (in_f ** 0.5)
        w = jax.random.uniform(next(keys), (in_f, out_f), jnp.float32, -bound, bound)
        b = jax.random.uniform(next(keys), (out_f,), jnp.float32, -bound, bound)
        return w, b

    params = {
        'stem_w': conv_w(64, 3, 3, 3),
        'stem_ln_g': jnp.ones((64,), jnp.float32),
        'stem_ln_b': jnp.zeros((64,), jnp.float32),
        'layers': [],
    }
    inplanes = 64
    for planes, nblocks, stride in LAYER_CFG:
        blocks = []
        for bi in range(nblocks):
            s = stride if bi == 0 else 1
            inp = inplanes if bi == 0 else planes
            bp = {
                'conv1_w': conv_w(planes, inp, 3, 3),
                'conv1_b': conv_b(planes, inp * 9),       # custom Conv2d defaults bias=True
                'ln1_g': jnp.ones((planes,), jnp.float32),
                'ln1_b': jnp.zeros((planes,), jnp.float32),
                'conv2_w': conv_w(planes, planes, 3, 3),
                'ln2_g': jnp.ones((planes,), jnp.float32),
                'ln2_b': jnp.zeros((planes,), jnp.float32),
            }
            if bi == 0 and (s != 1 or inp != planes):
                bp['down_w'] = conv_w(planes, inp, 1, 1)
                bp['dln_g'] = jnp.ones((planes,), jnp.float32)
                bp['dln_b'] = jnp.zeros((planes,), jnp.float32)
            blocks.append(bp)
        params['layers'].append(blocks)
        inplanes = planes

    fc_w, fc_b = lin(512, num_classes)
    params['fc_w'], params['fc_b'] = fc_w, fc_b
    return params


if __name__ == "__main__":
    key = jax.random.PRNGKey(0)
    pkey, xkey = jax.random.split(key)

    num_classes = 10
    params = init_params(num_classes, pkey)

    # One-time weight preprocessing (WS + transpose + pad + bf16), hoisted out of the forward.
    pp = preprocess_params(params)
    pp = jax.block_until_ready(pp)

    # Small NCHW input consistent with the module (3-channel images).
    x = jax.random.normal(xkey, (2, 3, 16, 16), jnp.float32)

    fwd = jax.jit(resnet_forward, static_argnums=(2,))
    out = fwd(pp, x, num_classes)
    out = jax.block_until_ready(out)

    assert out.shape == (2, num_classes), out.shape
    assert bool(jnp.all(jnp.isfinite(out)))
    print("KERNEL_OK")
</pallas_src>

<mosaic_0001>
module attributes {stable_mosaic.version = 11 : i64} {
  func.func @kernel(%arg0: memref<64x27xf32, #tpu.memory_space<vmem>>, %arg1: memref<64x27xf32, #tpu.memory_space<vmem>>) attributes {dimension_semantics = [], scalar_prefetch = 0 : i64, scratch_operands = 0 : i64, tpu.core_type = #tpu.core_type<tc>} {
    %c0 = arith.constant 0 : index
    %c0_0 = arith.constant 0 : index
    %0 = vector.load %arg0[%c0, %c0_0] : memref<64x27xf32, #tpu.memory_space<vmem>>, vector<64x27xf32>
    %cst = arith.constant dense<0.000000e+00> : vector<64xf32>
    %1 = vector.multi_reduction <add>, %0, %cst [1] : vector<64x27xf32> to vector<64xf32>
    %2 = vector.shape_cast %1 : vector<64xf32> to vector<64x1xf32>
    %cst_1 = arith.constant 2.700000e+01 : f32
    %3 = vector.broadcast %cst_1 : f32 to vector<64x1xf32>
    %4 = arith.divf %2, %3 : vector<64x1xf32>
    %5 = vector.broadcast %4 : vector<64x1xf32> to vector<64x27xf32>
    %6 = arith.subf %0, %5 : vector<64x27xf32>
    %7 = arith.mulf %6, %6 : vector<64x27xf32>
    %cst_2 = arith.constant dense<0.000000e+00> : vector<64xf32>
    %8 = vector.multi_reduction <add>, %7, %cst_2 [1] : vector<64x27xf32> to vector<64xf32>
    %9 = vector.shape_cast %8 : vector<64xf32> to vector<64x1xf32>
    %cst_3 = arith.constant 2.600000e+01 : f32
    %10 = vector.broadcast %cst_3 : f32 to vector<64x1xf32>
    %11 = arith.divf %9, %10 : vector<64x1xf32>
    %12 = math.sqrt %11 : vector<64x1xf32>
    %cst_4 = arith.constant 9.99999974E-6 : f32
    %13 = vector.broadcast %cst_4 : f32 to vector<64x1xf32>
    %14 = arith.addf %12, %13 : vector<64x1xf32>
    %15 = vector.broadcast %14 : vector<64x1xf32> to vector<64x27xf32>
    %16 = arith.divf %6, %15 : vector<64x27xf32>
    %c0_5 = arith.constant 0 : index
    %c0_6 = arith.constant 0 : index
    %17 = vector.load %arg1[%c0_5, %c0_6] : memref<64x27xf32, #tpu.memory_space<vmem>>, vector<64x27xf32>
    tpu.vector_store %arg1[%c0_5, %c0_6], %16 {strides = array<i32>} : memref<64x27xf32, #tpu.memory_space<vmem>>, vector<64x27xf32>,
    return
  }
}

</mosaic_0001>

<bundles_post_ra>
// kernel: tpu_custom_call.1
= control target key start
LH: loop header
LB: loop body
LE: loop exit
PB: predicated region body
PF: predicated region fallthrough
CT: control target
= control target key end

     0   :  { %vm16_vm0 = vcmask 220160   ;;  %s369_s0 = inlined_call_operand.vmem [shape: f32[64,27], index: 0, kind: input, shape index: {}]   ;;  %s370_s1 = inlined_call_operand.vmem [shape: f32[64,27], index: 1, kind: output, shape index: {}]  }
   0x1   :  { %v8_v0 = vld [vmem:[%s369_s0] sm:$0xff]  ;;  %v10_v1 = vld [vmem:[%s369_s0 + $0x10] sm:$0xff]  ;;  %v9_v2 = vld [vmem:[%s369_s0 + $0x8] sm:$0xff] }
   0x2   :  { %v17_v3 = vsel %vm16_vm0, %v8_v0, 0.0  ;;  %v23_v4 = vsel %vm16_vm0, %v10_v1, 0.0  ;;  %v11_v5 = vld [vmem:[%s369_s0 + $0x18] sm:$0xff]  ;;  %v20_v6 = vsel %vm16_vm0, %v9_v2, 0.0  ;;  %v12_v8 = vld [vmem:[%s369_s0 + $0x20] sm:$0xff]  ;;  %v13_v9 = vld [vmem:[%s369_s0 + $0x28] sm:$0xff] }
   0x3   :  { %18 = vadd.xlane.f32.xlu0 %v17_v3  ;;  %24 = vadd.xlane.f32.xlu1 %v23_v4  ;;  %v26_v7 = vsel %vm16_vm0, %v11_v5, 0.0  ;;  %v29_v10 = vsel %vm16_vm0, %v12_v8, 0.0  ;;  %v32_v11 = vsel %vm16_vm0, %v13_v9, 0.0  ;;  %v14_v12 = vld [vmem:[%s369_s0 + $0x30] sm:$0xff]  ;;  %v15_v13 = vld [vmem:[%s369_s0 + $0x38] sm:$0xff] }
   0x4   :  { %v35_v14 = vsel %vm16_vm0, %v14_v12, 0.0  ;;  %v38_v15 = vsel %vm16_vm0, %v15_v13, 0.0 }
   0x7   :  { %21 = vadd.xlane.f32.xlu0 %v20_v6  ;;  %27 = vadd.xlane.f32.xlu1 %v26_v7 }
   0xb   :  { %30 = vadd.xlane.f32.xlu0 %v29_v10  ;;  %33 = vadd.xlane.f32.xlu1 %v32_v11 }
   0xf   :  { %36 = vadd.xlane.f32.xlu0 %v35_v14  ;;  %39 = vadd.xlane.f32.xlu1 %v38_v15 }
  0x90   :  { %v19_v16 = vpop.xlane.xlu0 %18  ;;  %v25_v17 = vpop.xlane.xlu1 %24 }
  0x91   :  { %v42_v18 = vmul.f32 0.037037037, %v19_v16  ;;  %v44_v19 = vmul.f32 0.037037037, %v25_v17 }
  0x93   :  { %v265_v20 = vsub.f32 %v8_v0, %v42_v18  ;;  %v267_v21 = vsub.f32 %v10_v1, %v44_v19 }
  0x94   :  { %v22_v22 = vpop.xlane.xlu0 %21  ;;  %v28_v23 = vpop.xlane.xlu1 %27 }
  0x95   :  { %v43_v24 = vmul.f32 0.037037037, %v22_v22  ;;  %v45_v25 = vmul.f32 0.037037037, %v28_v23  ;;  %v58_v26 = vmul.f32 %v265_v20, %v265_v20  ;;  %v60_v27 = vmul.f32 %v267_v21, %v267_v21 }
  0x97   :  { %v273_v28 = vsub.f32 %v9_v2, %v43_v24  ;;  %v275_v29 = vsub.f32 %v11_v5, %v45_v25  ;;  %v66_v30 = vsel %vm16_vm0, %v58_v26, 0.0  ;;  %v72_v33 = vsel %vm16_vm0, %v60_v27, 0.0 }
  0x98   :  { %67 = vadd.xlane.f32.xlu0 %v66_v30  ;;  %v31_v31 = vpop.xlane.xlu0 %30  ;;  %v34_v32 = vpop.xlane.xlu1 %33 }
  0x99   :  { %v46_v34 = vmul.f32 0.037037037, %v31_v31  ;;  %v47_v35 = vmul.f32 0.037037037, %v34_v32  ;;  %v59_v36 = vmul.f32 %v273_v28, %v273_v28  ;;  %v61_v37 = vmul.f32 %v275_v29, %v275_v29 }
  0x9b   :  { %v283_v38 = vsub.f32 %v12_v8, %v46_v34  ;;  %v285_v39 = vsub.f32 %v13_v9, %v47_v35  ;;  %v69_v40 = vsel %vm16_vm0, %v59_v36, 0.0  ;;  %v75_v43 = vsel %vm16_vm0, %v61_v37, 0.0 }
  0x9c   :  { %73 = vadd.xlane.f32.xlu0 %v72_v33  ;;  %70 = vadd.xlane.f32.xlu1 %v69_v40  ;;  %v37_v41 = vpop.xlane.xlu0 %36  ;;  %v40_v42 = vpop.xlane.xlu1 %39 }
  0x9d   :  { %v48_v44 = vmul.f32 0.037037037, %v37_v41  ;;  %v49_v45 = vmul.f32 0.037037037, %v40_v42  ;;  %v62_v46 = vmul.f32 %v283_v38, %v283_v38  ;;  %v63_v47 = vmul.f32 %v285_v39, %v285_v39 }
  0x9f   :  { %v293_v48 = vsub.f32 %v14_v12, %v48_v44  ;;  %v295_v49 = vsub.f32 %v15_v13, %v49_v45  ;;  %v78_v50 = vsel %vm16_vm0, %v62_v46, 0.0  ;;  %v81_v51 = vsel %vm16_vm0, %v63_v47, 0.0 }
  0xa0   :  { %76 = vadd.xlane.f32.xlu1 %v75_v43  ;;  %79 = vadd.xlane.f32.xlu0 %v78_v50 }
  0xa1   :  { %v64_v52 = vmul.f32 %v293_v48, %v293_v48  ;;  %v65_v53 = vmul.f32 %v295_v49, %v295_v49 }
  0xa3   :  { %v84_v54 = vsel %vm16_vm0, %v64_v52, 0.0  ;;  %v87_v55 = vsel %vm16_vm0, %v65_v53, 0.0 }
  0xa4   :  { %82 = vadd.xlane.f32.xlu1 %v81_v51  ;;  %85 = vadd.xlane.f32.xlu0 %v84_v54 }
  0xa8   :  { %88 = vadd.xlane.f32.xlu1 %v87_v55 }
 0x125   :  { %v68_v56 = vpop.xlane.xlu0 %67 }
 0x126   :  { %v91_v57 = vmul.f32 0.03846154, %v68_v56 }
 0x128   :  { %191 = vrsqrt.f32 %v91_v57  ;;  %vm101_vm1 = vcmp.eq.f32.partialorder %v91_v57, inf  ;;  %v104_v8 = vand.u32 2147483648, %v91_v57  ;;  %vm103_vm2 = vcmp.eq.f32.partialorder %v91_v57, 0.0 }
 0x129   :  { %v71_v58 = vpop.xlane.xlu1 %70  ;;  %v74_v59 = vpop.xlane.xlu0 %73 }
 0x12a   :  { %v92_v60 = vmul.f32 0.03846154, %v71_v58  ;;  %v93_v61 = vmul.f32 0.03846154, %v74_v59 }
 0x12c   :  { %193 = vrsqrt.f32 %v92_v60  ;;  %vm108_vm3 = vcmp.eq.f32.partialorder %v92_v60, inf  ;;  %vm110_vm4 = vcmp.eq.f32.partialorder %v92_v60, 0.0  ;;  %v111_v17 = vand.u32 2147483648, %v92_v60 }
 0x12d   :  { %195 = vrsqrt.f32 %v93_v61  ;;  %v77_v62 = vpop.xlane.xlu1 %76  ;;  %v80_v63 = vpop.xlane.xlu0 %79  ;;  %vm115_vm5 = vcmp.eq.f32.partialorder %v93_v61, inf  ;;  %v118_v22 = vand.u32 2147483648, %v93_v61  ;;  %vm117_vm6 = vcmp.eq.f32.partialorder %v93_v61, 0.0 }
 0x12e   :  { %v94_v0 = vmul.f32 0.03846154, %v77_v62  ;;  %v95_v1 = vmul.f32 0.03846154, %v80_v63 }
 0x130   :  { %197 = vrsqrt.f32 %v94_v0  ;;  %vm122_vm7 = vcmp.eq.f32.partialorder %v94_v0, inf  ;;  %vm124_vm8 = vcmp.eq.f32.partialorder %v94_v0, 0.0  ;;  %v125_v33 = vand.u32 2147483648, %v94_v0 }
 0x131   :  { %199 = vrsqrt.f32 %v95_v1  ;;  %v83_v2 = vpop.xlane.xlu1 %82  ;;  %v86_v3 = vpop.xlane.xlu0 %85  ;;  %vm129_vm9 = vcmp.eq.f32.partialorder %v95_v1, inf  ;;  %v132_v36 = vand.u32 2147483648, %v95_v1  ;;  %vm131_vm10 = vcmp.eq.f32.partialorder %v95_v1, 0.0 }
 0x132   :  { %v192_v4 = vpop.eup %191  ;;  %v305_v5 = vmul.f32 0.03846154, %v83_v2  ;;  %v307_v6 = vmul.f32 0.03846154, %v86_v3 }
 0x133   :  { %v100_v7 = vmul.f32 %v192_v4, %v91_v57 }
 0x134   :  { %201 = vrsqrt.f32 %v305_v5  ;;  %vm136_vm11 = vcmp.eq.f32.partialorder %v305_v5, inf  ;;  %vm138_vm12 = vcmp.eq.f32.partialorder %v305_v5, 0.0  ;;  %v139_v47 = vand.u32 2147483648, %v305_v5 }
 0x135   :  { %v102_v9 = vsel %vm101_vm1, %v91_v57, %v100_v7  ;;  %203 = vrsqrt.f32 %v307_v6  ;;  %v89_v10 = vpop.xlane.xlu1 %88  ;;  %vm143_vm13 = vcmp.eq.f32.partialorder %v307_v6, inf  ;;  %v146_v52 = vand.u32 2147483648, %v307_v6 }
 0x136   :  { %v194_v11 = vpop.eup %193  ;;  %v105_v12 = vsel %vm103_vm2, %v104_v8, %v102_v9  ;;  %v311_v13 = vmul.f32 0.03846154, %v89_v10  ;;  %vm145_vm14 = vcmp.eq.f32.partialorder %v307_v6, 0.0 }
 0x137   :  { %v196_v14 = vpop.eup %195  ;;  %v155_v15 = vadd.f32 1e-05, %v105_v12  ;;  %v107_v16 = vmul.f32 %v194_v11, %v92_v60 }
 0x138   :  { %v114_v18 = vmul.f32 %v196_v14, %v93_v61  ;;  %205 = vrsqrt.f32 %v311_v13  ;;  %vm150_vm15 = vcmp.eq.f32.partialorder %v311_v13, inf  ;;  %v153_v62 = vand.u32 2147483648, %v311_v13 }
 0x139   :  { %207 = vrcp.f32 %v155_v15  ;;  %v109_v19 = vsel %vm108_vm3, %v92_v60, %v107_v16  ;;  %vm152_vm1 = vcmp.eq.f32.partialorder %v311_v13, 0.0 }
 0x13a   :  { %v198_v23 = vpop.eup %197  ;;  %v112_v24 = vsel %vm110_vm4, %v111_v17, %v109_v19  ;;  %v116_v25 = vsel %vm115_vm5, %v93_v61, %v114_v18 }
 0x13b   :  { %v200_v26 = vpop.eup %199  ;;  %v156_v27 = vadd.f32 1e-05, %v112_v24  ;;  %v119_v30 = vsel %vm117_vm6, %v118_v22, %v116_v25  ;;  %v121_v31 = vmul.f32 %v198_v23, %v94_v0 }
 0x13c   :  { %v157_v32 = vadd.f32 1e-05, %v119_v30  ;;  %v128_v34 = vmul.f32 %v200_v26, %v95_v1 }
 0x13d   :  { %209 = vrcp.f32 %v156_v27  ;;  %v123_v35 = vsel %vm122_vm7, %v94_v0, %v121_v31 }
 0x13e   :  { %v202_v37 = vpop.eup %201  ;;  %211 = vrcp.f32 %v157_v32  ;;  %v126_v40 = vsel %vm124_vm8, %v125_v33, %v123_v35  ;;  %v130_v41 = vsel %vm129_vm9, %v95_v1, %v128_v34 }
 0x13f   :  { %v204_v42 = vpop.eup %203  ;;  %v158_v43 = vadd.f32 1e-05, %v126_v40  ;;  %v133_v44 = vsel %vm131_vm10, %v132_v36, %v130_v41  ;;  %v135_v45 = vmul.f32 %v202_v37, %v305_v5 }
 0x140   :  { %v159_v46 = vadd.f32 1e-05, %v133_v44  ;;  %v142_v50 = vmul.f32 %v204_v42, %v307_v6 }
 0x141   :  { %213 = vrcp.f32 %v158_v43  ;;  %v137_v51 = vsel %vm136_vm11, %v305_v5, %v135_v45 }
 0x142   :  { %v206_v53 = vpop.eup %205  ;;  %215 = vrcp.f32 %v159_v46  ;;  %v140_v54 = vsel %vm138_vm12, %v139_v47, %v137_v51  ;;  %v144_v55 = vsel %vm143_vm13, %v307_v6, %v142_v50 }
 0x143   :  { %v208_v56 = vpop.eup %207  ;;  %v160_v57 = vadd.f32 1e-05, %v140_v54  ;;  %v147_v58 = vsel %vm145_vm14, %v146_v52, %v144_v55  ;;  %v149_v59 = vmul.f32 %v206_v53, %v311_v13 }
 0x144   :  { %v164_v60 = vmul.f32 %v208_v56, %v265_v20  ;;  %v161_v61 = vadd.f32 1e-05, %v147_v58 }
 0x145   :  { %217 = vrcp.f32 %v160_v57  ;;  %v151_v63 = vsel %vm150_vm15, %v311_v13, %v149_v59 }
 0x146   :  { %179 = vst.msk [vmem:[%s370_s1] sm:$0xff] %vm16_vm0, %v164_v60  ;;  %219 = vrcp.f32 %v161_v61  ;;  %v154_v0 = vsel %vm152_vm1, %v153_v62, %v151_v63 }
 0x147   :  { %v210_v1 = vpop.eup %209  ;;  %v162_v2 = vadd.f32 1e-05, %v154_v0 }
 0x148   :  { %v212_v20 = vpop.eup %211  ;;  %v166_v3 = vmul.f32 %v210_v1, %v273_v28 }
 0x149   :  { %v168_v4 = vmul.f32 %v212_v20, %v267_v21  ;;  %221 = vrcp.f32 %v162_v2 }
 0x14a   :  { %180 = vst.msk [vmem:[%s370_s1 + $0x8] sm:$0xff] %vm16_vm0, %v166_v3 }
 0x14b   :  { %v214_v5 = vpop.eup %213  ;;  %181 = vst.msk [vmem:[%s370_s1 + $0x10] sm:$0xff] %vm16_vm0, %v168_v4 }
 0x14c   :  { %v216_v6 = vpop.eup %215  ;;  %v170_v7 = vmul.f32 %v214_v5, %v275_v29 }
 0x14d   :  { %v172_v8 = vmul.f32 %v216_v6, %v283_v38 }
 0x14e   :  { %182 = vst.msk [vmem:[%s370_s1 + $0x18] sm:$0xff] %vm16_vm0, %v170_v7 }
 0x14f   :  { %v218_v21 = vpop.eup %217  ;;  %183 = vst.msk [vmem:[%s370_s1 + $0x20] sm:$0xff] %vm16_vm0, %v172_v8 }
 0x150   :  { %v220_v28 = vpop.eup %219  ;;  %v174_v9 = vmul.f32 %v218_v21, %v285_v39 }
 0x151   :  { %v176_v10 = vmul.f32 %v220_v28, %v293_v48 }
 0x152   :  { %184 = vst.msk [vmem:[%s370_s1 + $0x28] sm:$0xff] %vm16_vm0, %v174_v9 }
 0x153   :  { %v222_v29 = vpop.eup %221  ;;  %185 = vst.msk [vmem:[%s370_s1 + $0x30] sm:$0xff] %vm16_vm0, %v176_v10 }
 0x154   :  { %v178_v38 = vmul.f32 %v222_v29, %v295_v49 }
 0x156   :  { %186 = vst.msk [vmem:[%s370_s1 + $0x38] sm:$0xff] %vm16_vm0, %v178_v38 }

</bundles_post_ra>
